<compile_context>
chip_gen: v6e
topology: v6e:2x2x1
jax: 0.10.0
libtpu: 0.0.40
codegen_flags: <defaults>
</compile_context>

<pallas_src>
import jax
import jax.numpy as jnp
from jax import lax
from jax.experimental import pallas as pl
from jax.experimental.pallas import tpu as pltpu


_TARGET_BLOCK_BYTES = 4 << 20   # ~4 MiB per-step output block (roofline saturates here)
_MIN_BLOCK_BYTES = 1 << 20      # below this, ~0.35 us/step grid overhead starts to matter


def _broadcast_batch_kernel(pos_ref, o_ref):
    # pos_ref: (TH, L) lane-dense positional tile; o_ref: (TB, TH, L) output block.
    # Per-batch-row stores: stream the tile through vregs once per row instead of
    # materializing a (TB, TH, L) broadcast intermediate.
    tb = o_ref.shape[0]
    if tb <= 16:
        for i in range(tb):               # static unroll; LLO scheduler sees it all
            o_ref[i] = pos_ref[...]
    else:
        def body(i, carry):
            o_ref[i] = pos_ref[...]
            return carry
        lax.fori_loop(0, tb, body, 0)


def _vmem_budget_bytes():
    """Per-chip VMEM working budget (keeps >=50% headroom on every generation)."""
    try:
        cap = pltpu.get_tpu_info().vmem_capacity_bytes  # 64 MiB v7x, 128 MiB v5e/v6e
        return min(cap // 2, 64 << 20)
    except Exception:
        return 32 << 20  # safe default everywhere


def _num_tensorcores_per_chip():
    """Best-effort detection of v7x-style multi-TC chips."""
    try:
        kind = jax.devices()[0].device_kind.lower()
        if "v7" in kind or "7x" in kind:
            return 2
    except Exception:
        pass
    return 1


def _plan_tiles(B, H, L, itemsize, budget):
    """Pick (tb, th, vmem_limit) or return None if no feasible tiling fits VMEM."""
    lane_row_bytes = L * itemsize           # one (1, L) lane-dense row
    full_row_bytes = H * lane_row_bytes     # one batch row at full H

    # H tile: full H if one batch row fits in the target block, else a multiple of 8.
    if full_row_bytes <= _TARGET_BLOCK_BYTES or H <= 8:
        th = H
    else:
        th = max(8, (_TARGET_BLOCK_BYTES // lane_row_bytes) // 8 * 8)
        th = min(th, H)
    tile_bytes = th * lane_row_bytes

    # Batch tile sized to the ~4 MiB target block (NOT the whole VMEM budget).
    tb = int(max(1, min(B, _TARGET_BLOCK_BYTES // max(tile_bytes, 1))))

    # Keep >= ~4 grid steps while the block stays comfortably above the
    # per-step-overhead floor (preserves fill/writeback overlap, feeds megacore).
    nh = pl.cdiv(H, th)
    if nh * pl.cdiv(B, tb) < 4 and tb * tile_bytes > 2 * _MIN_BLOCK_BYTES:
        tb = max(1, min(tb, pl.cdiv(B, 4)))

    block_bytes = tb * tile_bytes
    # 2x double-buffered output blocks + 2x input tile (constant index_map means
    # the slab tile is only DMA'd when the H block changes; budget conservatively).
    needed = 2 * block_bytes + 2 * tile_bytes
    if needed > budget:
        return None
    vmem_limit = int(max(needed + (4 << 20), 32 << 20))
    return tb, th, vmem_limit


def _even_batch_grid(B, tb):
    """Best-effort: make the number of batch blocks even (and >=2 when B>=2) so
    CORE_PARALLEL gives each v7x TensorCore its own share of output DMAs."""
    nb = pl.cdiv(B, tb)
    if B >= 2 and nb == 1:
        tb = pl.cdiv(B, 2)
        nb = pl.cdiv(B, tb)
    if nb > 1 and nb % 2 == 1:
        tb_new = max(1, pl.cdiv(B, nb + 1))
        if pl.cdiv(B, tb_new) % 2 == 0:
            tb = tb_new
    return tb


def _broadcast_batch_pallas(pos_flat, B):
    """pos_flat: (H, L) -> (B, H, L); B-fold broadcast materialized via Pallas.
    Returns None when no tiling fits the VMEM budget (caller falls back to jnp)."""
    H, L = pos_flat.shape
    itemsize = pos_flat.dtype.itemsize
    budget = _vmem_budget_bytes()

    plan = _plan_tiles(B, H, L, itemsize, budget)
    if plan is None:
        return None
    tb, th, vmem_limit = plan

    if _num_tensorcores_per_chip() >= 2:
        tb = _even_batch_grid(B, tb)            # v7x: shard batch blocks per core
        batch_sem = pltpu.CORE_PARALLEL
        h_sem = pltpu.ARBITRARY
    else:
        batch_sem = "parallel"                  # single-TC chips: semantics are a no-op
        h_sem = "arbitrary"

    nb = pl.cdiv(B, tb)
    nh = pl.cdiv(H, th)

    return pl.pallas_call(
        _broadcast_batch_kernel,
        out_shape=jax.ShapeDtypeStruct((B, H, L), pos_flat.dtype),
        grid_spec=pltpu.PrefetchScalarGridSpec(
            num_scalar_prefetch=0,
            grid=(nb, nh),
            # Input tile only depends on the H block -> re-fetched nh times total.
            in_specs=[pl.BlockSpec((th, L), lambda b, h: (h, 0))],
            # One lane-dense (tb, th, L) output block per grid step.
            out_specs=pl.BlockSpec((tb, th, L), lambda b, h: (b, h, 0)),
        ),
        compiler_params=pltpu.CompilerParams(
            dimension_semantics=(batch_sem, h_sem),
            vmem_limit_bytes=vmem_limit,
        ),
    )(pos_flat)


def embedding2d_pos(col_w, row_w, B, use_pallas=None, out_dtype=None):
    """col_w: (W, F), row_w: (H, F) -> pos (B, H, W, 2F)."""
    W, F = col_w.shape
    H, F2 = row_w.shape
    assert F == F2, "row/col embeddings must share num_feat"
    L = W * 2 * F

    # --- one-time layout plumbing, O(H*W*F): build the positional slab ---
    # indices are arange(W) / arange(H) -> the embedding lookups are identity
    # gathers, so the slab is a broadcast + concat of the two weight tables.
    col_b = jnp.broadcast_to(col_w[None, :, :], (H, W, F))   # (H, W, F)
    row_b = jnp.broadcast_to(row_w[:, None, :], (H, W, F))   # (H, W, F)
    pos = jnp.concatenate([col_b, row_b], axis=-1)           # (H, W, 2F)
    if out_dtype is not None:
        pos = pos.astype(out_dtype)    # e.g. bf16: halves HBM writeback bytes

    out_bytes = B * H * L * pos.dtype.itemsize
    if use_pallas is None:
        # Small outputs: launch/grid overhead dominates; let XLA fuse the broadcast.
        use_pallas = out_bytes >= (4 << 20)

    if use_pallas:
        pos_flat = pos.reshape(H, L)                      # lane-dense, free reshape
        out_flat = _broadcast_batch_pallas(pos_flat, B)   # (B, H, L) or None
        if out_flat is not None:
            return out_flat.reshape(B, H, W, 2 * F)       # contiguous split -> free
        # No VMEM-feasible tiling (pathological H*W*F): fall through to jnp.
    return jnp.broadcast_to(pos[None], (B, H, W, 2 * F))


class Embedding2D:
    """JAX/Pallas port of the PyTorch module (tsfm/pe.py)."""

    def __init__(self, H, W, num_feat, key=None):
        self.H = H
        self.W = W
        self.num_feat = num_feat
        key = jax.random.PRNGKey(0) if key is None else key
        kr, kc = jax.random.split(key)
        # reset_parameters(): nn.init.uniform_ -> U[0, 1)
        self.row_embed = jax.random.uniform(kr, (H, num_feat), dtype=jnp.float32)
        self.col_embed = jax.random.uniform(kc, (W, num_feat), dtype=jnp.float32)

    def __call__(self, B, H_range=None, W_range=None, *, use_pallas=None,
                 out_dtype=None):
        # H_range / W_range are accepted but unused, exactly as in the reference.
        return embedding2d_pos(self.col_embed, self.row_embed, B,
                               use_pallas=use_pallas, out_dtype=out_dtype)


if __name__ == "__main__":
    key = jax.random.PRNGKey(0)
    B, H, W, num_feat = 2, 16, 16, 32

    module = Embedding2D(H, W, num_feat, key=key)

    # Force the Pallas path so the kernel is exercised even at this tiny size.
    out = module(B, use_pallas=True)
    out = jax.block_until_ready(out)

    # Reference: pure-jnp path (identity gathers + concat + batch broadcast).
    ref = jax.block_until_ready(module(B, use_pallas=False))

    assert out.shape == (B, H, W, 2 * num_feat), out.shape
    assert out.dtype == jnp.float32
    assert jnp.array_equal(out, ref), "mismatch vs. reference broadcast"

    print("KERNEL_OK")
</pallas_src>

<mosaic_0001>
module attributes {stable_mosaic.version = 11 : i64} {
  func.func @_broadcast_batch_kernel(%arg0: i32, %arg1: i32, %arg2: memref<16x1024xf32, #tpu.memory_space<vmem>>, %arg3: memref<2x16x1024xf32, #tpu.memory_space<vmem>>) attributes {dimension_semantics = [#tpu.dimension_semantics<parallel>, #tpu.dimension_semantics<arbitrary>], iteration_bounds = array<i64: 1, 1>, scalar_prefetch = 0 : i64, scratch_operands = 0 : i64, tpu.core_type = #tpu.core_type<tc>, window_params = [{transform_indices = @transform_0, window_bounds = array<i64: 16, 1024>}, {transform_indices = @transform_1, window_bounds = array<i64: 2, 16, 1024>}]} {
    %c0 = arith.constant 0 : index
    %c0_0 = arith.constant 0 : index
    %0 = vector.load %arg2[%c0, %c0_0] : memref<16x1024xf32, #tpu.memory_space<vmem>>, vector<16x1024xf32>
    %c0_1 = arith.constant 0 : index
    %c0_2 = arith.constant 0 : index
    %c0_3 = arith.constant 0 : index
    %1 = vector.load %arg3[%c0_1, %c0_2, %c0_3] : memref<2x16x1024xf32, #tpu.memory_space<vmem>>, vector<1x16x1024xf32>
    %2 = vector.shape_cast %1 : vector<1x16x1024xf32> to vector<16x1024xf32>
    %3 = vector.shape_cast %0 : vector<16x1024xf32> to vector<1x16x1024xf32>
    tpu.vector_store %arg3[%c0_1, %c0_2, %c0_3], %3 {strides = array<i32>} : memref<2x16x1024xf32, #tpu.memory_space<vmem>>, vector<1x16x1024xf32>,
    %c0_4 = arith.constant 0 : index
    %c0_5 = arith.constant 0 : index
    %4 = vector.load %arg2[%c0_4, %c0_5] : memref<16x1024xf32, #tpu.memory_space<vmem>>, vector<16x1024xf32>
    %c1 = arith.constant 1 : index
    %c0_6 = arith.constant 0 : index
    %c0_7 = arith.constant 0 : index
    %5 = vector.load %arg3[%c1, %c0_6, %c0_7] : memref<2x16x1024xf32, #tpu.memory_space<vmem>>, vector<1x16x1024xf32>
    %6 = vector.shape_cast %5 : vector<1x16x1024xf32> to vector<16x1024xf32>
    %7 = vector.shape_cast %4 : vector<16x1024xf32> to vector<1x16x1024xf32>
    tpu.vector_store %arg3[%c1, %c0_6, %c0_7], %7 {strides = array<i32>} : memref<2x16x1024xf32, #tpu.memory_space<vmem>>, vector<1x16x1024xf32>,
    return
  }
  func.func @transform_0(%arg0: i32, %arg1: i32) -> (i32, i32) {
    %c0_i32 = arith.constant 0 : i32
    %c0_i32_0 = arith.constant 0 : i32
    return %arg1, %c0_i32 : i32, i32
  }
  func.func @transform_1(%arg0: i32, %arg1: i32) -> (i32, i32, i32) {
    %c0_i32 = arith.constant 0 : i32
    %c0_i32_0 = arith.constant 0 : i32
    return %arg0, %arg1, %c0_i32 : i32, i32, i32
  }
}

</mosaic_0001>

<bundles_post_ra>
// kernel: tpu_custom_call.1
= control target key start
LH: loop header
LB: loop body
LE: loop exit
PB: predicated region body
PF: predicated region fallthrough
CT: control target
= control target key end

     0   :  { %6 = vsyncpa [#allocation3], 0  ;;  %s179_s0 = inlined_call_operand.hbm [shape: f32[16,1024], index: 0, kind: input, shape index: {}]   ;;  %s180_s1 = inlined_call_operand.hbm [shape: f32[2,16,1024], index: 1, kind: output, shape index: {}]  }
   0x1   :  { %7 = vsyncpa [#allocation4], 0  ;;  %s153_s6 = smov [#allocation2]  }
   0x2   :  { %s13_s7 = sshll.u32 %s153_s6, 4  ;;  %s14_s7 = int_to_ptr.vmem [resolvable:$true] %s13_s7 }
   0x3   :  { %s117_s8 = scalar_lea.vmem %s14_s7, 2048  ;;  %p122_p1 = scmp.lt.s32.totalorder %s14_s7, %s14_s7 }
   0x4   :  { %p118_p0 = scmp.ne.s32.totalorder %s14_s7, %s117_s8  ;;  %p123_p2 = scmp.lt.s32.totalorder %s117_s8, %s117_s8 }
   0x6   :  { %p124_p3 = por %p123_p2, %p122_p1 }
   0x8   :  { %p125_p4 = pnand %p124_p3, %p118_p0 }
   0xa   :  { %128 = shalt.err (!%p125_p4)
}
   0xb   :  { %s154_s9 = smov 1024   ;;  %s155_s10 = smov 64  }
   0xc   :  { %19 = dma.hbm_to_vmem [thread:$0]  %s179_s0, 2048, %s14_s7, [#allocation3], %s154_s9, %s154_s9, %s155_s10  }
   0xd   :  { %149 = dma.done.wait [#allocation3], 2048  }
   0xe   :  { %150 = vsyncadd [#allocation3], 4294965248  ;;  %v23_v0 = vld [vmem:[#allocation2] sm:$0xff]  ;;  %v24_v1 = vld [vmem:[#allocation2 + $0x8] sm:$0xff]  ;;  %s156_s13 = smov [#allocation5]  }
   0xf   :  { %v25_v2 = vld [vmem:[#allocation2 + $0x10] sm:$0xff]  ;;  %39 = vst [vmem:[#allocation5] sm:$0xff] %v23_v0  ;;  %40 = vst [vmem:[#allocation5 + $0x8] sm:$0xff] %v24_v1  ;;  %v26_v3 = vld [vmem:[#allocation2 + $0x18] sm:$0xff]  ;;  %s93_s14 = sshll.u32 %s156_s13, 4  ;;  %s94_s14 = int_to_ptr.vmem [resolvable:$true] %s93_s14 }
  0x10   :  { %41 = vst [vmem:[#allocation5 + $0x10] sm:$0xff] %v25_v2  ;;  %v27_v4 = vld [vmem:[#allocation2 + $0x20] sm:$0xff]  ;;  %v28_v5 = vld [vmem:[#allocation2 + $0x28] sm:$0xff]  ;;  %72 = vst [vmem:[#allocation5 + $0x80] sm:$0xff] %v23_v0  ;;  %s129_s0 = scalar_lea.vmem %s94_s14, 4096  ;;  %p134_p6 = scmp.lt.s32.totalorder %s94_s14, %s94_s14 }
  0x11   :  { %73 = vst [vmem:[#allocation5 + $0x88] sm:$0xff] %v24_v1  ;;  %74 = vst [vmem:[#allocation5 + $0x90] sm:$0xff] %v25_v2  ;;  %v29_v6 = vld [vmem:[#allocation2 + $0x30] sm:$0xff]  ;;  %v30_v7 = vld [vmem:[#allocation2 + $0x38] sm:$0xff]  ;;  %p130_p5 = scmp.ne.s32.totalorder %s94_s14, %s129_s0  ;;  %p135_p7 = scmp.lt.s32.totalorder %s129_s0, %s129_s0 }
  0x12   :  { %42 = vst [vmem:[#allocation5 + $0x18] sm:$0xff] %v26_v3  ;;  %43 = vst [vmem:[#allocation5 + $0x20] sm:$0xff] %v27_v4  ;;  %v31_v8 = vld [vmem:[#allocation2 + $0x40] sm:$0xff]  ;;  %v32_v9 = vld [vmem:[#allocation2 + $0x48] sm:$0xff] }
  0x13   :  { %44 = vst [vmem:[#allocation5 + $0x28] sm:$0xff] %v28_v5  ;;  %75 = vst [vmem:[#allocation5 + $0x98] sm:$0xff] %v26_v3  ;;  %v33_v10 = vld [vmem:[#allocation2 + $0x50] sm:$0xff]  ;;  %v34_v11 = vld [vmem:[#allocation2 + $0x58] sm:$0xff]  ;;  %p136_p8 = por %p135_p7, %p134_p6 }
  0x14   :  { %76 = vst [vmem:[#allocation5 + $0xa0] sm:$0xff] %v27_v4  ;;  %77 = vst [vmem:[#allocation5 + $0xa8] sm:$0xff] %v28_v5  ;;  %v35_v12 = vld [vmem:[#allocation2 + $0x60] sm:$0xff]  ;;  %v36_v13 = vld [vmem:[#allocation2 + $0x68] sm:$0xff] }
  0x15   :  { %45 = vst [vmem:[#allocation5 + $0x30] sm:$0xff] %v29_v6  ;;  %46 = vst [vmem:[#allocation5 + $0x38] sm:$0xff] %v30_v7  ;;  %v37_v14 = vld [vmem:[#allocation2 + $0x70] sm:$0xff]  ;;  %v38_v15 = vld [vmem:[#allocation2 + $0x78] sm:$0xff]  ;;  %p137_p9 = pnand %p136_p8, %p130_p5 }
  0x16   :  { %47 = vst [vmem:[#allocation5 + $0x40] sm:$0xff] %v31_v8  ;;  %78 = vst [vmem:[#allocation5 + $0xb0] sm:$0xff] %v29_v6 }
  0x17   :  { %79 = vst [vmem:[#allocation5 + $0xb8] sm:$0xff] %v30_v7  ;;  %80 = vst [vmem:[#allocation5 + $0xc0] sm:$0xff] %v31_v8 }
  0x18   :  { %48 = vst [vmem:[#allocation5 + $0x48] sm:$0xff] %v32_v9  ;;  %49 = vst [vmem:[#allocation5 + $0x50] sm:$0xff] %v33_v10 }
  0x19   :  { %50 = vst [vmem:[#allocation5 + $0x58] sm:$0xff] %v34_v11  ;;  %81 = vst [vmem:[#allocation5 + $0xc8] sm:$0xff] %v32_v9 }
  0x1a   :  { %82 = vst [vmem:[#allocation5 + $0xd0] sm:$0xff] %v33_v10  ;;  %83 = vst [vmem:[#allocation5 + $0xd8] sm:$0xff] %v34_v11 }
  0x1b   :  { %51 = vst [vmem:[#allocation5 + $0x60] sm:$0xff] %v35_v12  ;;  %52 = vst [vmem:[#allocation5 + $0x68] sm:$0xff] %v36_v13 }
  0x1c   :  { %53 = vst [vmem:[#allocation5 + $0x70] sm:$0xff] %v37_v14  ;;  %84 = vst [vmem:[#allocation5 + $0xe0] sm:$0xff] %v35_v12 }
  0x1d   :  { %85 = vst [vmem:[#allocation5 + $0xe8] sm:$0xff] %v36_v13  ;;  %86 = vst [vmem:[#allocation5 + $0xf0] sm:$0xff] %v37_v14 }
  0x1e   :  { %54 = vst [vmem:[#allocation5 + $0x78] sm:$0xff] %v38_v15  ;;  %87 = vst [vmem:[#allocation5 + $0xf8] sm:$0xff] %v38_v15 }
  0x1f   :  { %140 = shalt.err (!%p137_p9)
}
  0x20   :  { %99 = dma.vmem_to_hbm [thread:$0]  %s94_s14, 4096, %s180_s1, [#allocation4], %s154_s9, %s154_s9, %s155_s10  }
  0x21   :  { %151 = dma.done.wait [#allocation4], 4096  }
  0x22   :  { %152 = vsyncadd [#allocation4], 4294963200 }
  0x23   :  { %103 = vsyncpa [#allocation3], 1 }
  0x24   :  { %104 = vsyncpa [#allocation4], 1 }

</bundles_post_ra>
